<compile_context>
chip_gen: v5e
topology: v5e:2x2
jax: 0.10.0
libtpu: 0.0.40
codegen_flags: <defaults>
</compile_context>

<pallas_src>
import jax
import jax.numpy as jnp
from jax.experimental import pallas as pl
from jax.experimental.pallas import tpu as pltpu

# --- small, module-consistent config (synthetic) ---
BATCH = 2
SEQ = 16
HIDDEN = 32
NUM_HEADS = 4
HEAD_DIM = HIDDEN // NUM_HEADS
SCALE = HEAD_DIM ** -0.5
# attention_dropout = 0.0  -> dropout is a no-op, omitted.


def _attn_kernel(x_ref, wqkv_ref, bqkv_ref, wo_ref, bo_ref, o_ref):
    S, D = x_ref.shape                 # batch dim squeezed by BlockSpec -> (S, D)
    H, hd = NUM_HEADS, HEAD_DIM

    x = x_ref[...]                                               # (S, D)

    # Fused Q/K/V projection: one dense, lane-dense MXU matmul + one bias add.
    # Attention scale is already folded into the Q columns / bias (wrapper-side).
    qkv = jnp.dot(x, wqkv_ref[...],
                  preferred_element_type=jnp.float32) + bqkv_ref[...]   # (S, 3D)

    # Head split: static lane slices stacked head-major so the attention core is
    # two leading-batch 3-D einsums (no per-head Python matmul loop).
    def heads(base):
        return jnp.stack(
            [qkv[:, base + h * hd: base + (h + 1) * hd] for h in range(H)],
            axis=0)                                              # (H, S, hd)

    q = heads(0)
    k = heads(D)
    v = heads(2 * D)

    # Per-head scores + float32 softmax (K = hd is fixed by the algorithm).
    s = jnp.einsum('hqe,hke->hqk', q, k,
                   preferred_element_type=jnp.float32)           # (H, S, S)
    s = s - jnp.max(s, axis=-1, keepdims=True)
    p = jnp.exp(s)
    # Exact reciprocal keeps the 1e-4 match with the f32 reference softmax.
    p = p * pl.reciprocal(jnp.sum(p, axis=-1, keepdims=True), approx=False)

    ctx = jnp.einsum('hqk,hke->hqe', p, v,
                     preferred_element_type=jnp.float32)         # (H, S, hd)

    # Concatenate heads back into lanes, then ONE dense out-projection (K = D).
    ctx2 = jnp.concatenate([ctx[h] for h in range(H)], axis=-1)  # (S, D)
    out = jnp.dot(ctx2, wo_ref[...],
                  preferred_element_type=jnp.float32) + bo_ref[...]

    o_ref[...] = out.astype(o_ref.dtype)


def pack_params(wq, bq, wk, bk, wv, bv, wo, bo):
    """One-time, lane-dense parameter repack (no head or batch replication)."""
    w_qkv = jnp.concatenate([wq * SCALE, wk, wv], axis=1)        # (D, 3D)
    b_qkv = jnp.concatenate([bq * SCALE, bk, bv], axis=1)        # (1, 3D)
    return w_qkv, b_qkv, wo, bo


def siglip_attention(x, w_qkv, b_qkv, w_o, b_o):
    B, S, D = x.shape

    def shared(shape):   # parameters: same block every grid step (no re-DMA)
        return pl.BlockSpec(shape, lambda b: (0,) * len(shape))

    return pl.pallas_call(
        _attn_kernel,
        out_shape=jax.ShapeDtypeStruct((B, S, D), x.dtype),
        grid_spec=pltpu.PrefetchScalarGridSpec(
            num_scalar_prefetch=0,
            grid=(B,),                                           # one batch elem / step
            in_specs=[
                pl.BlockSpec((None, S, D), lambda b: (b, 0, 0)),  # x[b]  (batch squeezed)
                shared(w_qkv.shape),     # (D, 3D) fused qkv weights (scale folded)
                shared(b_qkv.shape),     # (1, 3D) fused qkv bias
                shared(w_o.shape),       # (D, D)  out-proj weights
                shared(b_o.shape),       # (1, D)  out-proj bias
            ],
            out_specs=pl.BlockSpec((None, S, D), lambda b: (b, 0, 0)),
        ),
        compiler_params=pltpu.CompilerParams(
            # "parallel" lets v7x shard the batch steps across its 2 TensorCores;
            # on single-TC v5e/v6e it is just a short sequential loop.
            dimension_semantics=("parallel",)),
    )(x, w_qkv, b_qkv, w_o, b_o)


def _reference(x, wq, bq, wk, bk, wv, bv, wo, bo):
    B, S, D = x.shape
    q = x @ wq + bq
    k = x @ wk + bk
    v = x @ wv + bv
    q = q.reshape(B, S, NUM_HEADS, HEAD_DIM).transpose(0, 2, 1, 3)
    k = k.reshape(B, S, NUM_HEADS, HEAD_DIM).transpose(0, 2, 1, 3)
    v = v.reshape(B, S, NUM_HEADS, HEAD_DIM).transpose(0, 2, 1, 3)
    scores = jnp.einsum('bhqd,bhkd->bhqk', q, k) * SCALE
    p = jax.nn.softmax(scores.astype(jnp.float32), axis=-1).astype(q.dtype)
    ctx = jnp.einsum('bhqk,bhkd->bhqd', p, v)
    ctx = ctx.transpose(0, 2, 1, 3).reshape(B, S, D)
    return ctx @ wo + bo


if __name__ == "__main__":
    key = jax.random.PRNGKey(0)
    kx, kq, kk, kv, ko, kbq, kbk, kbv, kbo = jax.random.split(key, 9)

    x = jax.random.normal(kx, (BATCH, SEQ, HIDDEN), dtype=jnp.float32)

    def init_w(k):
        return (jax.random.normal(k, (HIDDEN, HIDDEN), dtype=jnp.float32)
                * (1.0 / HIDDEN ** 0.5))

    def init_b(k):
        return jax.random.normal(k, (1, HIDDEN), dtype=jnp.float32) * 0.01

    wq, wk, wv, wo = init_w(kq), init_w(kk), init_w(kv), init_w(ko)
    bq, bk, bv, bo = init_b(kbq), init_b(kbk), init_b(kbv), init_b(kbo)

    # One-time parameter repack (done at setup, not per forward call).
    w_qkv, b_qkv, wo_p, bo_p = pack_params(wq, bq, wk, bk, wv, bv, wo, bo)

    out = siglip_attention(x, w_qkv, b_qkv, wo_p, bo_p)
    out = jax.block_until_ready(out)

    ref = _reference(x, wq, bq, wk, bk, wv, bv, wo, bo)
    assert out.shape == (BATCH, SEQ, HIDDEN)
    assert jnp.allclose(out, ref, atol=1e-4, rtol=1e-4), "mismatch vs reference"

    print("KERNEL_OK")
</pallas_src>

<mosaic_0001>
module attributes {stable_mosaic.version = 11 : i64} {
  func.func @_attn_kernel(%arg0: i32, %arg1: memref<1x16x32xf32, #tpu.memory_space<vmem>>, %arg2: memref<32x96xf32, #tpu.memory_space<vmem>>, %arg3: memref<1x96xf32, #tpu.memory_space<vmem>>, %arg4: memref<32x32xf32, #tpu.memory_space<vmem>>, %arg5: memref<1x32xf32, #tpu.memory_space<vmem>>, %arg6: memref<1x16x32xf32, #tpu.memory_space<vmem>>) attributes {dimension_semantics = [#tpu.dimension_semantics<parallel>], iteration_bounds = array<i64: 2>, scalar_prefetch = 0 : i64, scratch_operands = 0 : i64, tpu.core_type = #tpu.core_type<tc>, window_params = [{transform_indices = @transform_0, window_bounds = array<i64: 1, 16, 32>}, {pipeline_mode = #tpu.pipeline_mode<synchronous>, transform_indices = @transform_1, window_bounds = array<i64: 32, 96>}, {pipeline_mode = #tpu.pipeline_mode<synchronous>, transform_indices = @transform_2, window_bounds = array<i64: 1, 96>}, {pipeline_mode = #tpu.pipeline_mode<synchronous>, transform_indices = @transform_3, window_bounds = array<i64: 32, 32>}, {pipeline_mode = #tpu.pipeline_mode<synchronous>, transform_indices = @transform_4, window_bounds = array<i64: 1, 32>}, {transform_indices = @transform_5, window_bounds = array<i64: 1, 16, 32>}]} {
    %c0 = arith.constant 0 : index
    %c0_0 = arith.constant 0 : index
    %c0_1 = arith.constant 0 : index
    %0 = vector.load %arg1[%c0, %c0_0, %c0_1] : memref<1x16x32xf32, #tpu.memory_space<vmem>>, vector<1x16x32xf32>
    %1 = vector.shape_cast %0 : vector<1x16x32xf32> to vector<16x32xf32>
    %c0_2 = arith.constant 0 : index
    %c0_3 = arith.constant 0 : index
    %2 = vector.load %arg2[%c0_2, %c0_3] : memref<32x96xf32, #tpu.memory_space<vmem>>, vector<32x96xf32>
    %cst = arith.constant dense<0.000000e+00> : vector<16x96xf32>
    %3 = tpu.matmul %1, %2, %cst {dimension_numbers = #tpu.dot_dimension_numbers<[1], [0], [0], [1], [0, 0, 1, 1], [], []>} : vector<16x32xf32>, vector<32x96xf32>, vector<16x96xf32> -> vector<16x96xf32>
    %c0_4 = arith.constant 0 : index
    %c0_5 = arith.constant 0 : index
    %4 = vector.load %arg3[%c0_4, %c0_5] : memref<1x96xf32, #tpu.memory_space<vmem>>, vector<1x96xf32>
    %5 = vector.broadcast %4 : vector<1x96xf32> to vector<16x96xf32>
    %6 = arith.addf %3, %5 : vector<16x96xf32>
    %7 = vector.extract_strided_slice %6 {offsets = [0, 0], sizes = [16, 8], strides = [1, 1]} : vector<16x96xf32> to vector<16x8xf32>
    %8 = vector.extract_strided_slice %6 {offsets = [0, 8], sizes = [16, 8], strides = [1, 1]} : vector<16x96xf32> to vector<16x8xf32>
    %9 = vector.extract_strided_slice %6 {offsets = [0, 16], sizes = [16, 8], strides = [1, 1]} : vector<16x96xf32> to vector<16x8xf32>
    %10 = vector.extract_strided_slice %6 {offsets = [0, 24], sizes = [16, 8], strides = [1, 1]} : vector<16x96xf32> to vector<16x8xf32>
    %11 = vector.shape_cast %7 : vector<16x8xf32> to vector<1x16x8xf32>
    %12 = vector.shape_cast %8 : vector<16x8xf32> to vector<1x16x8xf32>
    %13 = vector.shape_cast %9 : vector<16x8xf32> to vector<1x16x8xf32>
    %14 = vector.shape_cast %10 : vector<16x8xf32> to vector<1x16x8xf32>
    %15 = tpu.concatenate %11, %12, %13, %14 in 0 : vector<1x16x8xf32>, vector<1x16x8xf32>, vector<1x16x8xf32>, vector<1x16x8xf32> -> vector<4x16x8xf32>
    %16 = vector.extract_strided_slice %6 {offsets = [0, 32], sizes = [16, 8], strides = [1, 1]} : vector<16x96xf32> to vector<16x8xf32>
    %17 = vector.extract_strided_slice %6 {offsets = [0, 40], sizes = [16, 8], strides = [1, 1]} : vector<16x96xf32> to vector<16x8xf32>
    %18 = vector.extract_strided_slice %6 {offsets = [0, 48], sizes = [16, 8], strides = [1, 1]} : vector<16x96xf32> to vector<16x8xf32>
    %19 = vector.extract_strided_slice %6 {offsets = [0, 56], sizes = [16, 8], strides = [1, 1]} : vector<16x96xf32> to vector<16x8xf32>
    %20 = vector.shape_cast %16 : vector<16x8xf32> to vector<1x16x8xf32>
    %21 = vector.shape_cast %17 : vector<16x8xf32> to vector<1x16x8xf32>
    %22 = vector.shape_cast %18 : vector<16x8xf32> to vector<1x16x8xf32>
    %23 = vector.shape_cast %19 : vector<16x8xf32> to vector<1x16x8xf32>
    %24 = tpu.concatenate %20, %21, %22, %23 in 0 : vector<1x16x8xf32>, vector<1x16x8xf32>, vector<1x16x8xf32>, vector<1x16x8xf32> -> vector<4x16x8xf32>
    %25 = vector.extract_strided_slice %6 {offsets = [0, 64], sizes = [16, 8], strides = [1, 1]} : vector<16x96xf32> to vector<16x8xf32>
    %26 = vector.extract_strided_slice %6 {offsets = [0, 72], sizes = [16, 8], strides = [1, 1]} : vector<16x96xf32> to vector<16x8xf32>
    %27 = vector.extract_strided_slice %6 {offsets = [0, 80], sizes = [16, 8], strides = [1, 1]} : vector<16x96xf32> to vector<16x8xf32>
    %28 = vector.extract_strided_slice %6 {offsets = [0, 88], sizes = [16, 8], strides = [1, 1]} : vector<16x96xf32> to vector<16x8xf32>
    %29 = vector.shape_cast %25 : vector<16x8xf32> to vector<1x16x8xf32>
    %30 = vector.shape_cast %26 : vector<16x8xf32> to vector<1x16x8xf32>
    %31 = vector.shape_cast %27 : vector<16x8xf32> to vector<1x16x8xf32>
    %32 = vector.shape_cast %28 : vector<16x8xf32> to vector<1x16x8xf32>
    %33 = tpu.concatenate %29, %30, %31, %32 in 0 : vector<1x16x8xf32>, vector<1x16x8xf32>, vector<1x16x8xf32>, vector<1x16x8xf32> -> vector<4x16x8xf32>
    "tpu.trace_start"() <{level = 10 : i32, message = "hqe,hke->hqk"}> : () -> ()
    %cst_6 = arith.constant dense<0.000000e+00> : vector<4x16x16xf32>
    %34 = tpu.matmul %15, %24, %cst_6 {dimension_numbers = #tpu.dot_dimension_numbers<[2], [2], [1], [1], [0, 0, 0, 1, 1, 1], [0], [0]>} : vector<4x16x8xf32>, vector<4x16x8xf32>, vector<4x16x16xf32> -> vector<4x16x16xf32>
    "tpu.trace_stop"() : () -> ()
    %cst_7 = arith.constant dense<0xFF800000> : vector<4x16xf32>
    %35 = vector.multi_reduction <maximumf>, %34, %cst_7 [2] : vector<4x16x16xf32> to vector<4x16xf32>
    %36 = vector.shape_cast %35 : vector<4x16xf32> to vector<4x16x1xf32>
    %37 = vector.broadcast %36 : vector<4x16x1xf32> to vector<4x16x16xf32>
    %38 = arith.subf %34, %37 : vector<4x16x16xf32>
    %39 = math.exp %38 : vector<4x16x16xf32>
    %cst_8 = arith.constant dense<0.000000e+00> : vector<4x16xf32>
    %40 = vector.multi_reduction <add>, %39, %cst_8 [2] : vector<4x16x16xf32> to vector<4x16xf32>
    %41 = vector.shape_cast %40 : vector<4x16xf32> to vector<4x16x1xf32>
    %42 = tpu.reciprocal %41 : vector<4x16x1xf32> -> vector<4x16x1xf32>
    %43 = vector.broadcast %42 : vector<4x16x1xf32> to vector<4x16x16xf32>
    %44 = arith.mulf %39, %43 : vector<4x16x16xf32>
    "tpu.trace_start"() <{level = 10 : i32, message = "hqk,hke->hqe"}> : () -> ()
    %cst_9 = arith.constant dense<0.000000e+00> : vector<4x16x8xf32>
    %45 = tpu.matmul %44, %33, %cst_9 {dimension_numbers = #tpu.dot_dimension_numbers<[2], [1], [1], [2], [0, 0, 0, 1, 1, 2], [0], [0]>} : vector<4x16x16xf32>, vector<4x16x8xf32>, vector<4x16x8xf32> -> vector<4x16x8xf32>
    "tpu.trace_stop"() : () -> ()
    %46 = vector.extract_strided_slice %45 {offsets = [0, 0, 0], sizes = [1, 16, 8], strides = [1, 1, 1]} : vector<4x16x8xf32> to vector<1x16x8xf32>
    %47 = vector.shape_cast %46 : vector<1x16x8xf32> to vector<16x8xf32>
    %48 = vector.extract_strided_slice %45 {offsets = [1, 0, 0], sizes = [1, 16, 8], strides = [1, 1, 1]} : vector<4x16x8xf32> to vector<1x16x8xf32>
    %49 = vector.shape_cast %48 : vector<1x16x8xf32> to vector<16x8xf32>
    %50 = vector.extract_strided_slice %45 {offsets = [2, 0, 0], sizes = [1, 16, 8], strides = [1, 1, 1]} : vector<4x16x8xf32> to vector<1x16x8xf32>
    %51 = vector.shape_cast %50 : vector<1x16x8xf32> to vector<16x8xf32>
    %52 = vector.extract_strided_slice %45 {offsets = [3, 0, 0], sizes = [1, 16, 8], strides = [1, 1, 1]} : vector<4x16x8xf32> to vector<1x16x8xf32>
    %53 = vector.shape_cast %52 : vector<1x16x8xf32> to vector<16x8xf32>
    %54 = tpu.concatenate %47, %49, %51, %53 in 1 : vector<16x8xf32>, vector<16x8xf32>, vector<16x8xf32>, vector<16x8xf32> -> vector<16x32xf32>
    %c0_10 = arith.constant 0 : index
    %c0_11 = arith.constant 0 : index
    %55 = vector.load %arg4[%c0_10, %c0_11] : memref<32x32xf32, #tpu.memory_space<vmem>>, vector<32x32xf32>
    %cst_12 = arith.constant dense<0.000000e+00> : vector<16x32xf32>
    %56 = tpu.matmul %54, %55, %cst_12 {dimension_numbers = #tpu.dot_dimension_numbers<[1], [0], [0], [1], [0, 0, 1, 1], [], []>} : vector<16x32xf32>, vector<32x32xf32>, vector<16x32xf32> -> vector<16x32xf32>
    %c0_13 = arith.constant 0 : index
    %c0_14 = arith.constant 0 : index
    %57 = vector.load %arg5[%c0_13, %c0_14] : memref<1x32xf32, #tpu.memory_space<vmem>>, vector<1x32xf32>
    %58 = vector.broadcast %57 : vector<1x32xf32> to vector<16x32xf32>
    %59 = arith.addf %56, %58 : vector<16x32xf32>
    %c0_15 = arith.constant 0 : index
    %c0_16 = arith.constant 0 : index
    %c0_17 = arith.constant 0 : index
    %60 = vector.load %arg6[%c0_15, %c0_16, %c0_17] : memref<1x16x32xf32, #tpu.memory_space<vmem>>, vector<1x16x32xf32>
    %61 = vector.shape_cast %60 : vector<1x16x32xf32> to vector<16x32xf32>
    %62 = vector.shape_cast %59 : vector<16x32xf32> to vector<1x16x32xf32>
    tpu.vector_store %arg6[%c0_15, %c0_16, %c0_17], %62 {strides = array<i32>} : memref<1x16x32xf32, #tpu.memory_space<vmem>>, vector<1x16x32xf32>,
    return
  }
  func.func @transform_0(%arg0: i32) -> (i32, i32, i32) {
    %c0_i32 = arith.constant 0 : i32
    %c0_i32_0 = arith.constant 0 : i32
    %c0_i32_1 = arith.constant 0 : i32
    return %arg0, %c0_i32, %c0_i32_0 : i32, i32, i32
  }
  func.func @transform_1(%arg0: i32) -> (i32, i32) {
    %c0_i32 = arith.constant 0 : i32
    %c0_i32_0 = arith.constant 0 : i32
    %c0_i32_1 = arith.constant 0 : i32
    return %c0_i32, %c0_i32_0 : i32, i32
  }
  func.func @transform_2(%arg0: i32) -> (i32, i32) {
    %c0_i32 = arith.constant 0 : i32
    %c0_i32_0 = arith.constant 0 : i32
    %c0_i32_1 = arith.constant 0 : i32
    return %c0_i32, %c0_i32_0 : i32, i32
  }
  func.func @transform_3(%arg0: i32) -> (i32, i32) {
    %c0_i32 = arith.constant 0 : i32
    %c0_i32_0 = arith.constant 0 : i32
    %c0_i32_1 = arith.constant 0 : i32
    return %c0_i32, %c0_i32_0 : i32, i32
  }
  func.func @transform_4(%arg0: i32) -> (i32, i32) {
    %c0_i32 = arith.constant 0 : i32
    %c0_i32_0 = arith.constant 0 : i32
    %c0_i32_1 = arith.constant 0 : i32
    return %c0_i32, %c0_i32_0 : i32, i32
  }
  func.func @transform_5(%arg0: i32) -> (i32, i32, i32) {
    %c0_i32 = arith.constant 0 : i32
    %c0_i32_0 = arith.constant 0 : i32
    %c0_i32_1 = arith.constant 0 : i32
    return %arg0, %c0_i32, %c0_i32_0 : i32, i32, i32
  }
}

</mosaic_0001>

<bundles_post_ra>
// kernel: tpu_custom_call.1
= control target key start
LH: loop header
LB: loop body
LE: loop exit
PB: predicated region body
PF: predicated region fallthrough
CT: control target
= control target key end

     0   :  { %10 = vsyncpa [#allocation3], 0  ;;  %s1768_s0 = inlined_call_operand.hbm [shape: f32[2,16,32], index: 0, kind: input, shape index: {}]   ;;  %s1769_s1 = inlined_call_operand.hbm [shape: f32[32,96], index: 1, kind: input, shape index: {}]   ;;  %s1770_s2 = inlined_call_operand.vmem [shape: f32[1,96], index: 2, kind: input, shape index: {}]   ;;  %s1771_s3 = inlined_call_operand.hbm [shape: f32[32,32], index: 3, kind: input, shape index: {}]   ;;  %s1772_s4 = inlined_call_operand.vmem [shape: f32[1,32], index: 4, kind: input, shape index: {}]   ;;  %s1773_s5 = inlined_call_operand.hbm [shape: f32[2,16,32], index: 5, kind: output, shape index: {}]  }
   0x1   :  { %12 = vsyncpa [#allocation3 + $0x1], 0 }
   0x2   :  { %13 = vsyncpa [#allocation6], 0 }
   0x3   :  { %14 = vsyncpa [#allocation4], 0 }
   0x4   :  { %16 = vsyncpa [#allocation4 + $0x1], 0  ;;  %s1375_s18 = smov 0   ;;  %s1377_s19 = smov 0  }
   0x5   :  { %s1379_s20 = smov 0   ;;  %s1381_s21 = smov 0  }
   0x6 LB: > { %s1396_s22 = sadd.s32 4294967295, %s1330_s21   ;;  %s984_s23 = sadd.s32 4294967294, %s1330_s21   ;;  %s1330_s21 = sphi %s1381_s21, %s1795_s21   ;;  %s1326_s20 = sphi %s1379_s20, %s1794_s20   ;;  %s1322_s19 = sphi %s1377_s19, %s1793_s19   ;;  %s1318_s18 = sphi %s1375_s18, %s1792_s18  }
   0x7   : > { %p42_p0 = scmp.ne.s32.totalorder %s1322_s19, %s1318_s18  ;;  %p43_p1 = scmp.eq.s32.totalorder %s1396_s22, 0 }
   0x8   : > { %p150_p2 = scmp.eq.s32.totalorder %s1396_s22, 1  ;;  %p156_p3 = scmp.eq.s32.totalorder %s984_s23, 1 }
   0x9   : > { %p1405_p4 = por %p43_p1, %p42_p0  ;;  %p985_p5 = scmp.ge.s32.totalorder %s1330_s21, 1 }
   0xa   : > { %p1410_p6 = por %p156_p3, %p42_p0  ;;  %p163_p7 = scmp.lt.s32.totalorder %s1330_s21, 3 }
   0xb   : > { %s174_s28 = sshll.u32 %s1769_s1, 4  ;;  %s1332_s30 = smov [#allocation5]   ;;  %s175_s28 = int_to_ptr.hbm [resolvable:$true] %s174_s28 }
   0xc   : > { %p1418_p8 = pnand %p985_p5, %p163_p7  ;;  %s176_s6 = sshll.u32 %s1332_s30, 4  ;;  %s177_s6 = int_to_ptr.vmem [resolvable:$true] %s176_s6 }
   0xd   : > { %s191_s9 = sshll.u32 %s1771_s3, 4  ;;  %s1774_s10 = smov 128   ;;  %s192_s9 = int_to_ptr.hbm [resolvable:$true] %s191_s9 }
   0xe   : > { %p1050_p9 = pneg %p1418_p8  ;;  %s1334_s11 = smov 8  }
   0xf   : > { %s1335_s12 = smov [#allocation7]   ;;  %s1437_s14 = sadd.s32 1, %s1330_s21  }
  0x10   : > { %p1051_p10 = pnand %p1050_p9, %p43_p1  ;;  %s193_s13 = sshll.u32 %s1335_s12, 4  ;;  %s194_s13 = int_to_ptr.vmem [resolvable:$true] %s193_s13 }
  0x11   : > { %s29_s15 = sadd.s32 1, %s1326_s20  ;;  %s26_s16 = ssub.s32 %s1330_s21, %s1437_s14 }
  0x12   : > { %1053 = dma.hbm_to_vmem [thread:$0]  (!%p1051_p10), %s175_s28, 512, %s177_s6, [#allocation6], %s1774_s10, %s1774_s10, %s1334_s11  }
  0x13   : > { %1056 = dma.hbm_to_vmem [thread:$0]  (!%p1051_p10), %s192_s9, 512, %s194_s13, [#allocation6], %s1774_s10, %s1774_s10, %s1334_s11  }
  0x14   : > { %p36_p12 = scmp.ne.s32.totalorder %s1326_s20, %s1322_s19  ;;  %p27_p13 = scmp.eq.s32.totalorder %s26_s16, 0 }
  0x15   : > { %p37_p0 = scmp.eq.s32.totalorder %s1330_s21, 0  ;;  %p1067_p5 = scmp.lt.s32.totalorder %s1330_s21, 2 }
  0x16   : > { %p1447_p3 = por %p150_p2, %p36_p12  ;;  %s210_s26 = sand.u32 1, %s1326_s20  }
  0x17   : > { %s1453_s23 = scalar_select %p27_p13, %s1326_s20, %s29_s15  }
  0x18   : > { %p38_p7 = por %p37_p0, %p36_p12  ;;  %s989_s27 = sshll.u32 %s210_s26, 4 }
  0x19   : > { %s1030_s28 = sshll.u32 %s1330_s21, 4  ;;  %s214_s8 = scalar_lea.vmem [#allocation2], %s989_s27 }
  0x1a   : > { %s219_s7 = scalar_lea.hbm %s1768_s0, %s1030_s28  ;;  %s222_s9 = sshll.u32 %s214_s8, 4  ;;  %s223_s9 = int_to_ptr.vmem [resolvable:$true] %s222_s9 }
  0x1b   : > { %s220_s12 = sshll.u32 %s219_s7, 4  ;;  %p1460_p2 = pnand %p1067_p5, %p38_p7  ;;  %s221_s12 = int_to_ptr.hbm [resolvable:$true] %s220_s12 }
  0x1c   : > { %s211_s15 = scalar_lea.sflag [#allocation3], %s210_s26  ;;  %s1230_s16 = sshra.s32 %s221_s12, 4  ;;  %s1231_s16 = int_to_ptr.hbm [resolvable:$true] %s1230_s16 }
  0x1d   : > { %s1232_s10 = scalar_lea.hbm %s1231_s16, 16  ;;  %p1234_p10 = pneg %p1460_p2 }
  0x1e   : > { %p1233_p9 = scmp.ne.s32.totalorder %s1231_s16, %s1232_s10  ;;  %s1237_s30 = scalar_lea.hbm %s1768_s0, 32 }
  0x1f   : > { %p1238_p0 = scmp.lt.s32.totalorder %s1231_s16, %s1768_s0  ;;  %p1239_p5 = scmp.lt.s32.totalorder %s1237_s30, %s1232_s10 }
  0x20   : > { %p1235_p12 = pnand %p1234_p10, %p1233_p9 }
  0x21   : > { %p1240_p7 = por %p1239_p5, %p1238_p0 }
  0x22   : > { %p1236_p13 = pneg %p1235_p12 }
  0x24   : > { %p1241_p11 = pnand %p1240_p7, %p1236_p13 }
  0x26   : > { %1244 = shalt.err (!%p1241_p11)
}
  0x27   : > { %s1780_s26 = smov 128   ;;  %234 = sbr.rel (%p1418_p8) target bundleno = 1238 (0x4d6), region = 40 }
  0x28   : > { %1060 = dma.hbm_to_vmem [thread:$0]  (!%p1460_p2), %s221_s12, 256, %s223_s9, %s211_s15, %s1780_s26, %s1780_s26, %s1334_s11  }
  0x29   : > { %s1480_s8 = sand.u32 (!%p1418_p8), 1, %s1322_s19  }
  0x2a   : > { %s993_s10 = sshll.u32 (!%p1418_p8), %s1480_s8, 4  ;;  %s237_s16 = scalar_lea.sflag (!%p1418_p8), [#allocation3], %s1480_s8 }
  0x2b   : > { %s240_s28 = scalar_lea.vmem (!%p1418_p8), [#allocation2], %s993_s10 }
  0x2c   : > { %1305 = dma.done.wait (%p1405_p4), %s237_s16, 256  }
  0x2d   : > { %1307 = vsyncadd (%p1405_p4), %s237_s16, 4294967040 }
  0x2e   : > { %1309 = dma.done.wait (%p43_p1), [#allocation6], 1024  }
  0x2f   : > { %1311 = vsyncadd (%p43_p1), [#allocation6], 4294966272  ;;  %v283_v0 = vld [vmem:[#allocation5 + $0x18] sm:$0xff]  ;;  %v282_v1 = vld [vmem:[#allocation5 + $0x10] sm:$0xff]  ;;  %vm288_vm0 = vcmask 261120   ;;  %s1336_s11 = smov 120  }
  0x30   : > { %307 = vmatpush.msra.mxu0 %v283_v0  ;;  %1032 = vmatpush.msra.mxu2 %v283_v0  ;;  %v281_v2 = vld [vmem:[#allocation5 + $0x8] sm:$0xff]  ;;  %v280_v3 = vld [vmem:[#allocation5] sm:$0xff]  ;;  %s1337_s9 = smov 104   ;;  %s1338_s12 = smov 112   ;;  %vm336_vm1 = vcmask 64512   ;;  %vm473_vm2 = vcmask 130048  }
  0x31   : > { %v278_v4 = vld [vmem:[%s240_s28] sm:$0xff]  ;;  %v279_v5 = vld [vmem:[%s240_s28 + $0x8] sm:$0xff]  ;;  %s1339_s13 = smov 96   ;;  %s1340_s15 = smov 64  }
  0x32   : > { %308 = vmatpush.msra.mxu0 %v282_v1  ;;  %1033 = vmatpush.msra.mxu2 %v282_v1  ;;  %v1136_v6 = vld [vmem:[%s1770_s2] ss:$0 sm:$0xff]  ;;  %s1341_s27 = smov 24   ;;  %s1342_s30 = smov 8  }
  0x33   : > { %s1343_s6 = smov 16   ;;  %s277_s16 = scalar_lea.vmem [#allocation8], %s993_s10 }
  0x34   : > { %309 = vmatpush.msra.mxu0 %v281_v2  ;;  %1034 = vmatpush.msra.mxu2 %v281_v2  ;;  %s1031_s28 = sshll.u32 %s1396_s22, 4 }
  0x36   : > { %310 = vmatpush.msra.mxu0 %v280_v3  ;;  %1035 = vmatpush.msra.mxu2 %v280_v3 }
  0x37   : > { %997 = vmatmul.msk.f32.vlgmr.msra.gmra.mxu0 %vm288_vm0, %v278_v4  ;;  %998 = vmatmul.msk.f32.vlgmr.msra.gmra.mxu2 %vm288_vm0, %v279_v5 }
  0xb4   : > { %v312_v7 = vpop.f32.mrf.mxu0 }
  0xb5   : > { %v1499_v8 = vadd.f32 %v1136_v6, %v312_v7 }
  0xb7   : > { %320 = vrot.lane.b32.xlu1 %v1499_v8, %s1336_s11 }
  0xba   : > { %v315_v9 = vpop.f32.mrf.mxu2 }
  0xbb   : > { %v1502_v10 = vadd.f32 %v1136_v6, %v315_v9 }
  0xbd   : > { %330 = vrot.lane.b32.xlu2 %v1502_v10, %s1337_s9  ;;  %322 = vrot.lane.b32.xlu0 %v1502_v10, %s1336_s11  ;;  %s888_s11 = scalar_lea.hbm %s1773_s5, %s1031_s28 }
  0xbf   : > { %324 = vrot.lane.b32.xlu1 %v1499_v8, %s1338_s12 }
  0xc5   : > { %326 = vrot.lane.b32.xlu0 %v1502_v10, %s1338_s12  ;;  %328 = vrot.lane.b32.xlu2 %v1499_v8, %s1337_s9  ;;  %s889_s9 = sshll.u32 %s277_s16, 4  ;;  %s891_s12 = sshll.u32 %s888_s11, 4  ;;  %s890_s9 = int_to_ptr.vmem [resolvable:$true] %s889_s9  ;;  %s892_s12 = int_to_ptr.hbm [resolvable:$true] %s891_s12 }
  0xc7   : > { %332 = vrot.lane.b32.xlu1 %v1499_v8, %s1339_s13 }
  0xcd   : > { %334 = vrot.lane.b32.xlu0 %v1502_v10, %s1339_s13 }
 0x117   : > { %v1511_v11 = vpop.permute.xlu2 %330 }
 0x11f   : > { %v1519_v14 = vpop.permute.xlu2 %328 }
 0x129   : > { %v1513_v12 = vpop.permute.xlu1 %320 }
 0x12a   : > { %368 = vrot.lane.b32.xlu1 %v1513_v12, %s1339_s13 }
 0x12f   : > { %v1516_v13 = vpop.permute.xlu0 %322 }
 0x130   : > { %370 = vrot.lane.b32.xlu2 %v1516_v13, %s1339_s13 }
 0x131   : > { %v1522_v15 = vpop.permute.xlu1 %324 }
 0x132   : > { %438 = vrot.lane.b32.xlu1 %v1519_v14, %s1339_s13  ;;  %v1121_v9 = vpack.i.bf16 %v1522_v15, %v1513_v12 }
 0x137   : > { %v1524_v16 = vpop.permute.xlu0 %326 }
 0x138   : > { %405 = vrot.lane.b32.xlu0 %v1524_v16, %s1339_s13  ;;  %403 = vrot.lane.b32.xlu2 %v1522_v15, %s1339_s13  ;;  %v1116_v7 = vpack.i.bf16 %v1524_v16, %v1516_v13 }
 0x139   : > { %v333_v18 = vpop.permute.xlu1 %332 }
 0x13f   : > { %v335_v17 = vpop.permute.xlu0 %334 }
 0x140   : > { %440 = vrot.lane.b32.xlu0 %v1511_v11, %s1339_s13  ;;  %999 = vmatpush.xpose.msk.msra.mxu1 %vm336_vm1, %v335_v17  ;;  %s877_s13 = scalar_lea.sflag [#allocation4], %s1480_s8 }
 0x141   : > { %1036 = vmatpush.xpose.msk.msra.mxu3 %vm336_vm1, %v335_v17  ;;  %v1126_v17 = vpack.i.bf16 %v1519_v14, %v1511_v11 }
 0x144   : > { %1000 = vmatpush.xpose.msk.msra.mxu1 %vm336_vm1, %v333_v18 }
 0x145   : > { %1037 = vmatpush.xpose.msk.msra.mxu3 %vm336_vm1, %v333_v18 }
 0x147   : > { %1001 = vmatmul.msk.f32.vlgmr.msra.gmra.mxu1 %vm336_vm1, %v1499_v8 }
 0x148   : > { %1002 = vmatmul.msk.f32.vlgmr.msra.gmra.mxu3 %vm336_vm1, %v1502_v10 }
 0x18a   : > { %v371_v19 = vpop.permute.xlu2 %370 }
 0x18b   : > { %1003 = vmatpush.xpose.msk.msrb.mxu2 %vm336_vm1, %v371_v19 }
 0x192   : > { %v404_v22 = vpop.permute.xlu2 %403 }
 0x19c   : > { %v369_v20 = vpop.permute.xlu1 %368 }
 0x19d   : > { %1004 = vmatpush.xpose.msk.msrb.mxu2 %vm336_vm1, %v369_v20  ;;  %v1131_v20 = vpack.i.bf16 %v1499_v8, %v1502_v10 }
 0x1a0   : > { %1005 = vmatmul.msk.f32.vlgmr.msrb.gmra.mxu2 %vm336_vm1, %v1513_v12 }
 0x1a4   : > { %v439_v24 = vpop.permute.xlu1 %438 }
 0x1a8   : > { %1006 = vmatmul.msk.f32.gmra.mxu2 %vm336_vm1, %v1516_v13 }
 0x1aa   : > { %v406_v21 = vpop.permute.xlu0 %405 }
 0x1ab   : > { %1007 = vmatpush.xpose.msk.msrb.mxu3 %vm336_vm1, %v406_v21 }
 0x1af   : > { %1008 = vmatpush.xpose.msk.msrb.mxu3 %vm336_vm1, %v404_v22 }
 0x1b2   : > { %v441_v23 = vpop.permute.xlu0 %440  ;;  %1009 = vmatmul.msk.f32.vlgmr.msrb.gmra.mxu3 %vm336_vm1, %v1522_v15 }
 0x1b3   : > { %1011 = vmatpush.xpose.msk.msrb.mxu0 %vm336_vm1, %v441_v23 }
 0x1b7   : > { %1012 = vmatpush.xpose.msk.msrb.mxu0 %vm336_vm1, %v439_v24 }
 0x1ba   : > { %1010 = vmatmul.msk.f32.gmra.mxu3 %vm336_vm1, %v1524_v16  ;;  %1013 = vmatmul.msk.f32.vlgmr.msrb.gmra.mxu0 %vm336_vm1, %v1519_v14 }
 0x1c2   : > { %1014 = vmatmul.msk.f32.gmra.mxu0 %vm336_vm1, %v1511_v11 }
 0x1c4   : > { %v1559_v30 = vpop.f32.mrf.mxu1 }
 0x1c5   : > { %v474_v31 = vsel %vm473_vm2, %v1559_v30, -inf }
 0x1cb   : > { %v1557_v29 = vpop.f32.mrf.mxu3 }
 0x1cc   : > { %v477_v40 = vsel %vm473_vm2, %v1557_v29, -inf }
 0x223   : > { %v397_v25 = vpop.f32.mrf.mxu2 }
 0x224   : > { %v480_v26 = vsel %vm473_vm2, %v397_v25, -inf }
 0x225   : > { %481 = vmax.xlane.f32.xlu2 %v480_v26 }
 0x22b   : > { %v400_v27 = vpop.f32.mrf.mxu2 }
 0x22c   : > { %v483_v28 = vsel %vm473_vm2, %v400_v27, -inf }
 0x22d   : > { %484 = vmax.xlane.f32.xlu1 %v483_v28 }
 0x235   : > { %v432_v32 = vpop.f32.mrf.mxu3  ;;  %475 = vmax.xlane.f32.xlu1 %v474_v31 }
 0x236   : > { %v486_v33 = vsel %vm473_vm2, %v432_v32, -inf }
 0x237   : > { %487 = vmax.xlane.f32.xlu0 %v486_v33  ;;  %v467_v34 = vpop.f32.mrf.mxu0 }
 0x238   : > { %v492_v35 = vsel %vm473_vm2, %v467_v34, -inf }
 0x239   : > { %493 = vmax.xlane.f32.xlu2 %v492_v35 }
 0x23d   : > { %v435_v36 = vpop.f32.mrf.mxu3 }
 0x23e   : > { %v489_v38 = vsel %vm473_vm2, %v435_v36, -inf }
 0x23f   : > { %v470_v37 = vpop.f32.mrf.mxu0 }
 0x240   : > { %v495_v39 = vsel %vm473_vm2, %v470_v37, -inf }
 0x241   : > { %490 = vmax.xlane.f32.xlu2 %v489_v38  ;;  %496 = vmax.xlane.f32.xlu0 %v495_v39 }
 0x249   : > { %478 = vmax.xlane.f32.xlu0 %v477_v40 }
 0x298   : > { %v482_v41 = vpop.xlane.xlu2 %481 }
 0x299   : > { %v500_v42 = vsub.f32 %v397_v25, %v482_v41 }
 0x29b   : > { %v510_v43 = vmul.f32 1.442695, %v500_v42 }
 0x29d   : > { %1138 = vpow2.f32 %v510_v43 }
 0x2a0   : > { %v485_v55 = vpop.xlane.xlu1 %484 }
 0x2a1   : > { %v501_v62 = vsub.f32 %v400_v27, %v485_v55 }
 0x2a3   : > { %v1569_v44 = vpop.eup %1138  ;;  %v512_v0 = vmul.f32 1.442695, %v501_v62 }
 0x2a4   : > { %v528_v45 = vsel %vm473_vm2, %v1569_v44, 0.0 }
 0x2a5   : > { %529 = vadd.xlane.f32.xlu2 %v528_v45 }
 0x2a8   : > { %v476_v18 = vpop.xlane.xlu1 %475 }
 0x2a9   : > { %v498_v19 = vsub.f32 %v1559_v30, %v476_v18 }
 0x2aa   : > { %v488_v46 = vpop.xlane.xlu0 %487 }
 0x2ab   : > { %v502_v47 = vsub.f32 %v432_v32, %v488_v46  ;;  %v506_v21 = vmul.f32 1.442695, %v498_v19 }
 0x2ac   : > { %v494_v48 = vpop.xlane.xlu2 %493 }
 0x2ad   : > { %v514_v49 = vmul.f32 1.442695, %v502_v47  ;;  %v504_v50 = vsub.f32 %v467_v34, %v494_v48 }
 0x2af   : > { %1140 = vpow2.f32 %v514_v49  ;;  %v518_v51 = vmul.f32 1.442695, %v504_v50 }
 0x2b1   : > { %1142 = vpow2.f32 %v518_v51 }
 0x2b4   : > { %v491_v52 = vpop.xlane.xlu2 %490  ;;  %v497_v53 = vpop.xlane.xlu0 %496 }
 0x2b5   : > { %v1573_v54 = vpop.eup %1140  ;;  %v503_v56 = vsub.f32 %v435_v36, %v491_v52  ;;  %v505_v57 = vsub.f32 %v470_v37, %v497_v53 }
 0x2b6   : > { %v534_v58 = vsel %vm473_vm2, %v1573_v54, 0.0 }
 0x2b7   : > { %v1577_v59 = vpop.eup %1142  ;;  %v516_v60 = vmul.f32 1.442695, %v503_v56  ;;  %v520_v61 = vmul.f32 1.442695, %v505_v57  ;;  %535 = vadd.xlane.f32.xlu1 %v534_v58 }
 0x2b8   : > { %v540_v63 = vsel %vm473_vm2, %v1577_v59, 0.0 }
 0x2b9   : > { %1144 = vpow2.f32 %v516_v60  ;;  %541 = vadd.xlane.f32.xlu0 %v540_v63 }
 0x2ba   : > { %1146 = vpow2.f32 %v520_v61 }
 0x2bb   : > { %1148 = vpow2.f32 %v512_v0 }
 0x2bc   : > { %1150 = vpow2.f32 %v506_v21  ;;  %v479_v13 = vpop.xlane.xlu0 %478 }
 0x2bd   : > { %v499_v16 = vsub.f32 %v1557_v29, %v479_v13 }
 0x2bf   : > { %v1581_v1 = vpop.eup %1144  ;;  %v508_v12 = vmul.f32 1.442695, %v499_v16 }
 0x2c0   : > { %v1583_v2 = vpop.eup %1146  ;;  %v537_v3 = vsel %vm473_vm2, %v1581_v1, 0.0 }
 0x2c1   : > { %538 = vadd.xlane.f32.xlu1 %v537_v3  ;;  %v543_v4 = vsel %vm473_vm2, %v1583_v2, 0.0  ;;  %v1589_v5 = vpop.eup %1148  ;;  %1152 = vpow2.f32 %v508_v12 }
 0x2c2   : > { %544 = vadd.xlane.f32.xlu2 %v543_v4  ;;  %v531_v6 = vsel %vm473_vm2, %v1589_v5, 0.0  ;;  %v1603_v22 = vpop.eup %1150 }
 0x2c3   : > { %v522_v15 = vsel %vm473_vm2, %v1603_v22, 0.0 }
 0x2c7   : > { %v1607_v11 = vpop.eup %1152 }
 0x2c8   : > { %v525_v14 = vsel %vm473_vm2, %v1607_v11, 0.0 }
 0x2ca   : > { %532 = vadd.xlane.f32.xlu2 %v531_v6 }
 0x2cd   : > { %1117 = vrot.lane.b32.xlu0 %v1116_v7, %s1340_s15 }
 0x2da   : > { %1122 = vrot.lane.b32.xlu1 %v1121_v9, %s1340_s15 }
 0x2e2   : > { %1127 = vrot.lane.b32.xlu2 %v1126_v17, %s1340_s15 }
 0x2ea   : > { %1132 = vrot.lane.b32.xlu2 %v1131_v20, %s1340_s15  ;;  %s1274_s15 = sshra.s32 %s892_s12, 4  ;;  %s1275_s15 = int_to_ptr.hbm [resolvable:$true] %s1274_s15 }
 0x2eb   : > { %s1276_s10 = scalar_lea.hbm %s1275_s15, 16  ;;  %p1281_p11 = scmp.lt.s32.totalorder %s1275_s15, %s1773_s5 }
 0x2ec   : > { %p1277_p1 = scmp.ne.s32.totalorder %s1275_s15, %s1276_s10 }
 0x2ee   : > { %p1278_p4 = pnand %p1277_p1, %p1447_p3 }
 0x2f0   : > { %p1279_p8 = pneg %p1278_p4 }
 0x2f7   : > { %523 = vadd.xlane.f32.xlu0 %v522_v15 }
 0x304   : > { %526 = vadd.xlane.f32.xlu1 %v525_v14 }
 0x318   : > { %v530_v8 = vpop.xlane.xlu2 %529 }
 0x319   : > { %1154 = vrcp.f32 %v530_v8  ;;  %vm579_vm4 = vweird.f32 %v530_v8  ;;  %v585_v38 = vand.u32 2147483648, %v530_v8  ;;  %v583_v45 = vand.u32 2147483647, %v530_v8 }
 0x31b   : > { %v586_v55 = vor.u32 1.1754944e-38, %v585_v38  ;;  %vm584_vm8 = vcmp.eq.f32.partialorder %v583_v45, 8.507059e+37 }
 0x31f   : > { %v1155_v10 = vpop.eup %1154 }
 0x320   : > { %v575_v25 = vmul.f32 %v1155_v10, %v530_v8  ;;  %vm580_vm3 = vweird.f32 %v1155_v10 }
 0x321   : > { %vm1632_vm5 = vmor %vm579_vm4, %vm580_vm3 }
 0x322   : > { %v576_v27 = vsub.f32 1.0, %v575_v25 }
 0x324   : > { %v577_v32 = vmul.f32 %v1155_v10, %v576_v27 }
 0x326   : > { %v578_v35 = vadd.f32 %v1155_v10, %v577_v32 }
 0x328   : > { %v582_v46 = vsel %vm1632_vm5, %v1155_v10, %v578_v35 }
 0x329   : > { %v587_v60 = vsel %vm584_vm8, %v586_v55, %v582_v46 }
 0x32a   : > { %v1611_v24 = vpop.xlane.xlu1 %535  ;;  %v660_v25 = vmul.f32 %v1569_v44, %v587_v60 }
 0x32b   : > { %vm607_vm10 = vweird.f32 %v1611_v24  ;;  %v611_v0 = vand.u32 2147483647, %v1611_v24  ;;  %v613_v17 = vand.u32 2147483648, %v1611_v24 }
 0x32c   : > { %v542_v23 = vpop.xlane.xlu0 %541 }
 0x32d   : > { %1156 = vrcp.f32 %v542_v23  ;;  %v639_v50 = vand.u32 2147483647, %v542_v23  ;;  %v641_v51 = vand.u32 2147483648, %v542_v23  ;;  %vm635_vm7 = vweird.f32 %v542_v23 }
 0x32e   : > { %1158 = vrcp.f32 %v1611_v24  ;;  %vm612_vm3 = vcmp.eq.f32.partialorder %v611_v0, 8.507059e+37 }
 0x32f   : > { %vm640_vm11 = vcmp.eq.f32.partialorder %v639_v50, 8.507059e+37  ;;  %v642_v3 = vor.u32 1.1754944e-38, %v641_v51 }
 0x333   : > { %v1157_v26 = vpop.eup %1156 }
 0x334   : > { %v631_v28 = vmul.f32 %v1157_v26, %v542_v23  ;;  %v1616_v30 = vpop.xlane.xlu1 %538  ;;  %v1618_v31 = vpop.eup %1158  ;;  %vm636_vm6 = vweird.f32 %v1157_v26 }
 0x335   : > { %v1614_v29 = vpop.xlane.xlu2 %544  ;;  %v603_v34 = vmul.f32 %v1618_v31, %v1611_v24  ;;  %vm1642_vm9 = vmor %vm635_vm7, %vm636_vm6  ;;  %vm608_vm12 = vweird.f32 %v1618_v31  ;;  %v614_v24 = vor.u32 1.1754944e-38, %v613_v17  ;;  %v625_v45 = vand.u32 2147483647, %v1616_v30 }
 0x336   : > { %1160 = vrcp.f32 %v1614_v29  ;;  %v632_v33 = vsub.f32 1.0, %v631_v28  ;;  %v655_v19 = vand.u32 2147483648, %v1614_v29  ;;  %v653_v16 = vand.u32 2147483647, %v1614_v29  ;;  %vm1664_vm14 = vmor %vm607_vm10, %vm608_vm12 }
 0x337   : > { %1162 = vrcp.f32 %v1616_v30  ;;  %v604_v39 = vsub.f32 1.0, %v603_v34  ;;  %vm649_vm15 = vweird.f32 %v1614_v29  ;;  %v627_v28 = vand.u32 2147483648, %v1616_v30 }
 0x338   : > { %v633_v36 = vmul.f32 %v1157_v26, %v632_v33  ;;  %v656_v27 = vor.u32 1.1754944e-38, %v655_v19  ;;  %vm654_vm5 = vcmp.eq.f32.partialorder %v653_v16, 8.507059e+37 }
 0x339   : > { %v605_v56 = vmul.f32 %v1618_v31, %v604_v39 }
 0x33a   : > { %v634_v47 = vadd.f32 %v1157_v26, %v633_v36 }
 0x33b   : > { %v606_v4 = vadd.f32 %v1618_v31, %v605_v56 }
 0x33c   : > { %v1624_v37 = vpop.eup %1160  ;;  %v638_v61 = vsel %vm1642_vm9, %v1157_v26, %v634_v47  ;;  %vm621_vm9 = vweird.f32 %v1616_v30 }
 0x33d   : > { %v645_v40 = vmul.f32 %v1624_v37, %v1614_v29  ;;  %v1628_v41 = vpop.xlane.xlu2 %532  ;;  %v1630_v42 = vpop.eup %1162  ;;  %v643_v18 = vsel %vm640_vm11, %v642_v3, %v638_v61  ;;  %vm650_vm13 = vweird.f32 %v1624_v37  ;;  %v610_v14 = vsel %vm1664_vm14, %v1618_v31, %v606_v4 }
 0x33e   : > { %1164 = vrcp.f32 %v1628_v41  ;;  %v617_v57 = vmul.f32 %v1630_v42, %v1616_v30  ;;  %v664_v23 = vmul.f32 %v1577_v59, %v643_v18  ;;  %vm1676_vm4 = vmor %vm649_vm15, %vm650_vm13  ;;  %v615_v59 = vsel %vm612_vm3, %v614_v24, %v610_v14 }
 0x33f   : > { %v646_v48 = vsub.f32 1.0, %v645_v40  ;;  %v1118_v49 = vpop.permute.xlu0 %1117  ;;  %vm622_vm7 = vweird.f32 %v1630_v42  ;;  %v599_v44 = vand.u32 2147483648, %v1628_v41  ;;  %vm593_vm8 = vweird.f32 %v1628_v41 }
 0x340   : > { %v1120_v52 = vunpack.i.h.bf16 %v1118_v49  ;;  %v1119_v53 = vunpack.i.l.bf16 %v1118_v49  ;;  %v618_v6 = vsub.f32 1.0, %v617_v57  ;;  %v597_v39 = vand.u32 2147483647, %v1628_v41  ;;  %vm623_vm11 = vmor %vm621_vm9, %vm622_vm7 }
 0x341   : > { %v647_v62 = vmul.f32 %v1624_v37, %v646_v48  ;;  %v662_v40 = vmul.f32 %v1573_v54, %v615_v59  ;;  %v600_v54 = vor.u32 1.1754944e-38, %v599_v44  ;;  %v628_v49 = vor.u32 1.1754944e-38, %v627_v28 }
 0x342   : > { %727 = vmatpush.msra.mxu2 %v1119_v53  ;;  %762 = vmatpush.msra.mxu3 %v1120_v52  ;;  %v619_v8 = vmul.f32 %v1630_v42, %v618_v6  ;;  %vm598_vm12 = vcmp.eq.f32.partialorder %v597_v39, 8.507059e+37  ;;  %vm626_vm13 = vcmp.eq.f32.partialorder %v625_v45, 8.507059e+37  ;;  %vm834_vm9 = vcmask 195584  }
 0x343   : > { %v648_v13 = vadd.f32 %v1624_v37, %v647_v62 }
 0x344   : > { %v1649_v63 = vpop.eup %1164  ;;  %v620_v36 = vadd.f32 %v1630_v42, %v619_v8  ;;  %v839_v8 = vld [vmem:[#allocation7 + $0x10] sm:$0xff] }
 0x345   : > { %v589_v7 = vmul.f32 %v1649_v63, %v1628_v41  ;;  %v1128_v9 = vpop.permute.xlu2 %1127  ;;  %v652_v29 = vsel %vm1676_vm4, %v1624_v37, %v648_v13  ;;  %vm594_vm6 = vweird.f32 %v1649_v63 }
 0x346   : > { %v1129_v20 = vunpack.i.l.bf16 %v1128_v9  ;;  %v1130_v15 = vunpack.i.h.bf16 %v1128_v9  ;;  %v657_v37 = vsel %vm654_vm5, %v656_v27, %v652_v29  ;;  %vm1696_vm10 = vmor %vm593_vm8, %vm594_vm6  ;;  %v624_v48 = vsel %vm623_vm11, %v1630_v42, %v620_v36 }
 0x347   : > { %v590_v21 = vsub.f32 1.0, %v589_v7  ;;  %v665_v47 = vmul.f32 %v1583_v2, %v657_v37  ;;  %v629_v50 = vsel %vm626_vm13, %v628_v49, %v624_v48 }
 0x348   : > { %797 = vmatpush.msra.mxu0 %v1129_v20  ;;  %v663_v52 = vmul.f32 %v1581_v1, %v629_v50 }
 0x349   : > { %v591_v10 = vmul.f32 %v1649_v63, %v590_v21 }
 0x34a   : > { %798 = vmatpush.msra.mxu0 %v1130_v15 }
 0x34b   : > { %1021 = vmatmul.msk.f32.vlgmr.msra.gmra.mxu0 %vm473_vm2, %v664_v23  ;;  %v592_v32 = vadd.f32 %v1649_v63, %v591_v10  ;;  %v838_v10 = vld [vmem:[#allocation7 + $0x8] sm:$0xff]  ;;  %v837_v23 = vld [vmem:[#allocation7] sm:$0xff] }
 0x34c   : > { %v1123_v31 = vpop.permute.xlu1 %1122 }
 0x34d   : > { %v1133_v33 = vpop.permute.xlu2 %1132  ;;  %v1125_v34 = vunpack.i.h.bf16 %v1123_v31  ;;  %v1124_v35 = vunpack.i.l.bf16 %v1123_v31  ;;  %v596_v41 = vsel %vm1696_vm10, %v1649_v63, %v592_v32 }
 0x34e   : > { %v1134_v38 = vunpack.i.l.bf16 %v1133_v33  ;;  %v1135_v46 = vunpack.i.h.bf16 %v1133_v33  ;;  %v601_v30 = vsel %vm598_vm12, %v600_v54, %v596_v41 }
 0x34f   : > { %728 = vmatpush.msra.mxu2 %v1124_v35  ;;  %763 = vmatpush.msra.mxu3 %v1125_v34  ;;  %v661_v51 = vmul.f32 %v1589_v5, %v601_v30 }
 0x350   : > { %692 = vmatpush.msrb.mxu1 %v1134_v38  ;;  %1017 = vmatmul.msk.f32.vlgmr.msra.gmra.mxu2 %vm473_vm2, %v660_v25  ;;  %v1137_v38 = vld [vmem:[%s1772_s4] ss:$0 sm:$0xff] }
 0x351   : > { %1019 = vmatmul.msk.f32.vlgmr.msra.gmra.mxu3 %vm473_vm2, %v662_v40 }
 0x352   : > { %693 = vmatpush.msrb.mxu1 %v1135_v46 }
 0x353   : > { %1022 = vmatmul.msk.f32.gmra.mxu0 %vm473_vm2, %v665_v47 }
 0x358   : > { %1018 = vmatmul.msk.f32.gmra.mxu2 %vm473_vm2, %v661_v51 }
 0x359   : > { %1020 = vmatmul.msk.f32.gmra.mxu3 %vm473_vm2, %v663_v52 }
 0x36a   : > { %v524_v53 = vpop.xlane.xlu0 %523 }
 0x36b   : > { %1166 = vrcp.f32 %v524_v53  ;;  %v557_v56 = vand.u32 2147483648, %v524_v53  ;;  %v555_v58 = vand.u32 2147483647, %v524_v53  ;;  %vm551_vm15 = vweird.f32 %v524_v53 }
 0x36d   : > { %v558_v5 = vor.u32 1.1754944e-38, %v557_v56  ;;  %vm556_vm4 = vcmp.eq.f32.partialorder %v555_v58, 8.507059e+37 }
 0x371   : > { %v1167_v2 = vpop.eup %1166 }
 0x372   : > { %v547_v42 = vmul.f32 %v1167_v2, %v524_v53  ;;  %vm552_vm14 = vweird.f32 %v1167_v2 }
 0x373   : > { %vm553_vm3 = vmor %vm551_vm15, %vm552_vm14 }
 0x374   : > { %v548_v55 = vsub.f32 1.0, %v547_v42 }
 0x376   : > { %v549_v57 = vmul.f32 %v1167_v2, %v548_v55 }
 0x377   : > { %v527_v60 = vpop.xlane.xlu1 %526 }
 0x378   : > { %v550_v61 = vadd.f32 %v1167_v2, %v549_v57  ;;  %1168 = vrcp.f32 %v527_v60  ;;  %v571_v6 = vand.u32 2147483648, %v527_v60  ;;  %v569_v9 = vand.u32 2147483647, %v527_v60 }
 0x379   : > { %vm565_vm6 = vweird.f32 %v527_v60 }
 0x37a   : > { %v554_v1 = vsel %vm553_vm3, %v1167_v2, %v550_v61  ;;  %v572_v18 = vor.u32 1.1754944e-38, %v571_v6  ;;  %vm570_vm8 = vcmp.eq.f32.partialorder %v569_v9, 8.507059e+37 }
 0x37b   : > { %v559_v62 = vsel %vm556_vm4, %v558_v5, %v554_v1 }
 0x37c   : > { %v658_v63 = vmul.f32 %v1603_v22, %v559_v62 }
 0x37e   : > { %v1169_v0 = vpop.eup %1168  ;;  %1015 = vmatmul.msk.f32.vlgmr.msrb.gmra.mxu1 %vm473_vm2, %v658_v63 }
 0x37f   : > { %v561_v3 = vmul.f32 %v1169_v0, %v527_v60  ;;  %vm566_vm5 = vweird.f32 %v1169_v0 }
 0x380   : > { %vm567_vm7 = vmor %vm565_vm6, %vm566_vm5 }
 0x381   : > { %v562_v4 = vsub.f32 1.0, %v561_v3 }
 0x383   : > { %v563_v7 = vmul.f32 %v1169_v0, %v562_v4 }
 0x385   : > { %v564_v17 = vadd.f32 %v1169_v0, %v563_v7 }
 0x387   : > { %v568_v19 = vsel %vm567_vm7, %v1169_v0, %v564_v17 }
 0x388   : > { %v573_v20 = vsel %vm570_vm8, %v572_v18, %v568_v19 }
 0x389   : > { %v659_v21 = vmul.f32 %v1607_v11, %v573_v20  ;;  %v840_v11 = vld [vmem:[#allocation7 + $0x18] sm:$0xff] }
 0x38a   : > { %863 = vmatpush.msra.mxu1 %v840_v11 }
 0x38b   : > { %1016 = vmatmul.msk.f32.gmra.mxu1 %vm473_vm2, %v659_v21 }
 0x38c   : > { %864 = vmatpush.msra.mxu1 %v839_v8 }
 0x38e   : > { %865 = vmatpush.msra.mxu1 %v838_v10 }
 0x390   : > { %866 = vmatpush.msra.mxu1 %v837_v23 }
 0x3c8   : > { %v800_v22 = vpop.f32.mrf.mxu0 }
 0x3c9   : > { %824 = vrot.lane.b32.xlu2 %v800_v22, %s1341_s27 }
 0x3d0   : > { %v803_v13 = vpop.f32.mrf.mxu0 }
 0x3d1   : > { %826 = vrot.lane.b32.xlu1 %v803_v13, %s1341_s27 }
 0x3d3   : > { %v730_v16 = vpop.f32.mrf.mxu2 }
 0x3d4   : > { %808 = vrot.lane.b32.xlu2 %v730_v16, %s1342_s30  ;;  %v765_v12 = vpop.f32.mrf.mxu3 }
 0x3db   : > { %v733_v15 = vpop.f32.mrf.mxu2 }
 0x3dc   : > { %816 = vrot.lane.b32.xlu2 %v765_v12, %s1343_s6  ;;  %810 = vrot.lane.b32.xlu0 %v733_v15, %s1342_s30  ;;  %v768_v14 = vpop.f32.mrf.mxu3 }
 0x3e4   : > { %818 = vrot.lane.b32.xlu2 %v768_v14, %s1343_s6  ;;  %s1280_s6 = scalar_lea.hbm %s1773_s5, 32 }
 0x3e5   : > { %p1282_p2 = scmp.lt.s32.totalorder %s1280_s6, %s1276_s10 }
 0x3e7   : > { %p1283_p9 = por %p1282_p2, %p1281_p11 }
 0x3e9   : > { %p1284_p10 = pnand %p1283_p9, %p1279_p8 }
 0x3fb   : > { %v695_v26 = vpop.f32.mrf.mxu1 }
 0x408   : > { %v698_v31 = vpop.f32.mrf.mxu1 }
 0x423   : > { %v825_v24 = vpop.permute.xlu2 %824 }
 0x42e   : > { %v809_v25 = vpop.permute.xlu2 %808 }
 0x42f   : > { %v830_v27 = vsel %vm336_vm1, %v695_v26, %v809_v25 }
 0x436   : > { %v817_v28 = vpop.permute.xlu2 %816 }
 0x437   : > { %v832_v29 = vsel %vm473_vm2, %v830_v27, %v817_v28 }
 0x438   : > { %v835_v59 = vsel %vm834_vm9, %v832_v29, %v825_v24 }
 0x439   : > { %1023 = vmatmul.msk.f32.vlgmr.msra.gmra.mxu1 %vm288_vm0, %v835_v59 }
 0x43e   : > { %v819_v44 = vpop.permute.xlu2 %818 }
 0x443   : > { %v827_v34 = vpop.permute.xlu1 %826 }
 0x44e   : > { %v811_v32 = vpop.permute.xlu0 %810 }
 0x44f   : > { %v831_v33 = vsel %vm336_vm1, %v698_v31, %v811_v32 }
 0x450   : > { %v833_v35 = vsel %vm473_vm2, %v831_v33, %v819_v44 }
 0x451   : > { %v836_v36 = vsel %vm834_vm9, %v833_v35, %v827_v34 }
 0x452   : > { %1024 = vmatmul.msk.f32.gmra.mxu1 %vm288_vm0, %v836_v36 }
 0x4b6   : > { %v868_v37 = vpop.f32.mrf.mxu1 }
 0x4b7   : > { %v869_v39 = vadd.f32 %v1137_v38, %v868_v37 }
 0x4b9   : > { %874 = vst.msk [vmem:[%s277_s16] sm:$0xff] %vm288_vm0, %v869_v39 }
 0x4cf   : > { %v871_v40 = vpop.f32.mrf.mxu1 }
 0x4d0   : > { %v872_v43 = vadd.f32 %v1137_v38, %v871_v40 }
 0x4d2   : > { %875 = vst.msk [vmem:[%s277_s16 + $0x8] sm:$0xff] %vm288_vm0, %v872_v43 }
 0x4d3   : > { %1287 = shalt.err (!%p1284_p10)
}
 0x4d4   : > { %s1344_s8 = smov 128  }
 0x4d5   : > { %1048 = dma.vmem_to_hbm [thread:$0]  (%p1447_p3), %s890_s9, 256, %s892_s12, %s877_s13, %s1344_s8, %s1344_s8, %s1342_s30  }
 0x4d6 PF: > { %s906_s16 = sand.u32 1, %s1318_s18   ;;  %p1791_p12 = scmp.ge.s32.totalorder %s1330_s21, 2 }
 0x4d7   : > { %s907_s28 = scalar_lea.sflag [#allocation4], %s906_s16 }
 0x4d8   : > { %p1062_p13 = pnand %p1791_p12, %p1410_p6 }
 0x4da   : > { %p1063_p0 = pneg %p1062_p13 }
 0x4dc   : > { %1313 = dma.done.wait (%p1063_p0), %s907_s28, 256  }
 0x4dd   : > { %1315 = vsyncadd (%p1063_p0), %s907_s28, 4294967040  ;;  %p19_p5 = scmp.ge.s32.totalorder %s1437_s14, 4   ;;  %s1792_s18 = smov %s1322_s19 }
 0x4de   : > { %s1793_s19 = smov %s1326_s20  ;;  %s1794_s20 = smov %s1453_s23 }
 0x4df   : > { %s1795_s21 = smov %s1437_s14  ;;  %21 = sbr.rel (!%p19_p5) target bundleno = 6 (0x6), region = 93 }
 0x4e4   :  { %913 = vsyncpa [#allocation3], 1 }
 0x4e5   :  { %915 = vsyncpa [#allocation3 + $0x1], 1 }
 0x4e6   :  { %916 = vsyncpa [#allocation6], 1 }
 0x4e7   :  { %917 = vsyncpa [#allocation4], 1 }
 0x4e8   :  { %919 = vsyncpa [#allocation4 + $0x1], 1 }

</bundles_post_ra>
